<compile_context>
chip_gen: v6e
topology: v6e:2x2x1
jax: 0.10.0
libtpu: 0.0.40
codegen_flags: <defaults>
</compile_context>

<pallas_src>
import jax
import jax.numpy as jnp
from jax.experimental import pallas as pl
from jax.experimental.pallas import tpu as pltpu

D_IN = 784
H1, H2 = 256, 128
D_OUT, D_OUT_PAD = 10, 128     # lane-dense output; real logits are columns [:10]


def _round_up(a, m):
    return (a + m - 1) // m * m


def make_mlp_kernel(tb, sub):
    """Fused fc1+ReLU -> fc2+ReLU -> fc3 over one (tb, 784) bf16 batch tile.

    The tile is processed in `tb // sub` statically-unrolled row sub-chunks so
    the next chunk's MXU work overlaps the previous chunk's VPU epilogue.
    """
    assert tb % sub == 0
    n_sub = tb // sub

    def kernel(x_ref, w1_ref, b1_ref, w2_ref, b2_ref, w3_ref, b3_ref, o_ref):
        # Hoist weight/bias loads out of the sub-chunk loop (VMEM-resident).
        w1 = w1_ref[...]
        b1 = b1_ref[...]
        w2 = w2_ref[...]
        b2 = b2_ref[...]
        w3 = w3_ref[...]
        b3 = b3_ref[...]
        for c in range(n_sub):                                  # static unroll
            r = pl.ds(c * sub, sub)
            x = x_ref[r, :]                                     # bf16 (sub, 784)
            # fc1 + ReLU  (bf16 MXU inputs, f32 accumulate, f32 epilogue)
            h1 = jnp.dot(x, w1, preferred_element_type=jnp.float32) + b1
            h1 = jnp.maximum(h1, 0.0)
            # fc2 + ReLU
            h2 = jnp.dot(h1.astype(jnp.bfloat16), w2,
                         preferred_element_type=jnp.float32) + b2
            h2 = jnp.maximum(h2, 0.0)
            # fc3 (no activation); padded cols of w3/b3 are zero -> padded logits zero
            h3 = jnp.dot(h2.astype(jnp.bfloat16), w3,
                         preferred_element_type=jnp.float32) + b3
            o_ref[r, :] = h3.astype(o_ref.dtype)

    return kernel


def pack_params(params):
    """f32 (in,out) weights / (out,) biases -> bf16 weights + (1,out) f32 biases."""
    w1, b1, w2, b2, w3, b3 = params
    w1p = w1.astype(jnp.bfloat16)                                   # (784, 256)
    w2p = w2.astype(jnp.bfloat16)                                   # (256, 128)
    w3p = (jnp.zeros((H2, D_OUT_PAD), jnp.float32)
           .at[:, :D_OUT].set(w3).astype(jnp.bfloat16))             # (128, 128)
    b1p = b1.reshape(1, H1).astype(jnp.float32)
    b2p = b2.reshape(1, H2).astype(jnp.float32)
    b3p = jnp.zeros((1, D_OUT_PAD), jnp.float32).at[0, :D_OUT].set(b3)
    return (w1p, b1p, w2p, b2p, w3p, b3p)


def mlp_forward(x, packed_params, *, tb_max=1024):
    """x: any shape flattening to (-1, 784), like PyTorch x.view(-1, 784)."""
    w1, b1, w2, b2, w3, b3 = packed_params
    x2d = x.reshape(-1, D_IN)
    B = x2d.shape[0]

    # Rows padded only to the bf16 sublane multiple (16); pad+cast fused in one op.
    B_pad = _round_up(B, 16)
    if B_pad == B:
        x_in = x2d.astype(jnp.bfloat16)
    else:
        x_in = (jnp.zeros((B_pad, D_IN), jnp.bfloat16)
                .at[:B, :].set(x2d.astype(jnp.bfloat16)))

    # Batch tile: multiple of 16, <= tb_max, and sized so there are >= 2 tiles
    # whenever possible (v7x megacore: both TCs get work on the "parallel" axis).
    TB = max(16, min(tb_max, _round_up(pl.cdiv(B_pad, 2), 16), B_pad))
    grid = (pl.cdiv(B_pad, TB),)                 # ragged last block is fine (row-wise)

    # In-kernel sub-chunking for MXU/VPU overlap when the tile is large & aligned.
    SUB = 256 if (TB % 256 == 0) else TB

    out = pl.pallas_call(
        make_mlp_kernel(TB, SUB),
        out_shape=jax.ShapeDtypeStruct((B_pad, D_OUT_PAD), jnp.float32),
        grid_spec=pltpu.PrefetchScalarGridSpec(
            num_scalar_prefetch=0,
            grid=grid,
            in_specs=[
                pl.BlockSpec((TB, D_IN), lambda i: (i, 0)),       # bf16 x, pipelined
                pl.BlockSpec((D_IN, H1), lambda i: (0, 0)),       # weights VMEM-resident
                pl.BlockSpec((1, H1), lambda i: (0, 0)),
                pl.BlockSpec((H1, H2), lambda i: (0, 0)),
                pl.BlockSpec((1, H2), lambda i: (0, 0)),
                pl.BlockSpec((H2, D_OUT_PAD), lambda i: (0, 0)),
                pl.BlockSpec((1, D_OUT_PAD), lambda i: (0, 0)),
            ],
            out_specs=pl.BlockSpec((TB, D_OUT_PAD), lambda i: (i, 0)),
        ),
        compiler_params=pltpu.CompilerParams(
            dimension_semantics=("parallel",),   # shard batch tiles across TCs on v7x
        ),
    )(x_in, w1, b1, w2, b2, w3, b3)

    return out[:B, :D_OUT]


def init_params(key):
    """Deterministic init matching nn.Linear shapes; weights stored transposed (in, out)."""
    k1, k2, k3, k4, k5, k6 = jax.random.split(key, 6)

    def linear_init(kw, kb, fan_in, fan_out):
        bound = 1.0 / jnp.sqrt(fan_in)  # PyTorch nn.Linear default U(-1/sqrt(in), 1/sqrt(in))
        w_t = jax.random.uniform(kw, (fan_in, fan_out), jnp.float32, -bound, bound)
        b = jax.random.uniform(kb, (fan_out,), jnp.float32, -bound, bound)
        return w_t, b

    w1, b1 = linear_init(k1, k2, D_IN, H1)
    w2, b2 = linear_init(k3, k4, H1, H2)
    w3, b3 = linear_init(k5, k6, H2, D_OUT)
    return (w1, b1, w2, b2, w3, b3)


def mlp_reference(x, params):
    """Reference with matching bf16-input / f32-accumulate matmuls."""
    w1, b1, w2, b2, w3, b3 = params
    x2d = x.reshape(-1, D_IN).astype(jnp.float32)
    bf = jnp.bfloat16
    h1 = jnp.dot(x2d.astype(bf), w1.astype(bf), preferred_element_type=jnp.float32) + b1
    h1 = jnp.maximum(h1, 0.0)
    h2 = jnp.dot(h1.astype(bf), w2.astype(bf), preferred_element_type=jnp.float32) + b2
    h2 = jnp.maximum(h2, 0.0)
    return jnp.dot(h2.astype(bf), w3.astype(bf), preferred_element_type=jnp.float32) + b3


if __name__ == "__main__":
    key = jax.random.PRNGKey(0)
    k_params, k_x = jax.random.split(key)
    params = init_params(k_params)
    packed = pack_params(params)

    # MNIST-like input: batch of 8 images, 1x28x28 (flattened inside to (-1, 784))
    x = jax.random.normal(k_x, (8, 1, 28, 28), dtype=jnp.float32)

    out = mlp_forward(x, packed)
    out = jax.block_until_ready(out)

    ref = mlp_reference(x, params)
    assert out.shape == (8, D_OUT), out.shape
    assert jnp.allclose(out, ref, atol=5e-3, rtol=5e-3), "mismatch vs reference"

    print("KERNEL_OK")
</pallas_src>

<mosaic_0001>
module attributes {stable_mosaic.version = 11 : i64} {
  func.func @kernel(%arg0: i32, %arg1: memref<16x784xbf16, #tpu.memory_space<vmem>>, %arg2: memref<784x256xbf16, #tpu.memory_space<vmem>>, %arg3: memref<1x256xf32, #tpu.memory_space<vmem>>, %arg4: memref<256x128xbf16, #tpu.memory_space<vmem>>, %arg5: memref<1x128xf32, #tpu.memory_space<vmem>>, %arg6: memref<128x128xbf16, #tpu.memory_space<vmem>>, %arg7: memref<1x128xf32, #tpu.memory_space<vmem>>, %arg8: memref<16x128xf32, #tpu.memory_space<vmem>>) attributes {dimension_semantics = [#tpu.dimension_semantics<parallel>], iteration_bounds = array<i64: 1>, scalar_prefetch = 0 : i64, scratch_operands = 0 : i64, tpu.core_type = #tpu.core_type<tc>, window_params = [{transform_indices = @transform_0, window_bounds = array<i64: 16, 784>}, {pipeline_mode = #tpu.pipeline_mode<synchronous>, transform_indices = @transform_1, window_bounds = array<i64: 784, 256>}, {pipeline_mode = #tpu.pipeline_mode<synchronous>, transform_indices = @transform_2, window_bounds = array<i64: 1, 256>}, {pipeline_mode = #tpu.pipeline_mode<synchronous>, transform_indices = @transform_3, window_bounds = array<i64: 256, 128>}, {pipeline_mode = #tpu.pipeline_mode<synchronous>, transform_indices = @transform_4, window_bounds = array<i64: 1, 128>}, {pipeline_mode = #tpu.pipeline_mode<synchronous>, transform_indices = @transform_5, window_bounds = array<i64: 128, 128>}, {pipeline_mode = #tpu.pipeline_mode<synchronous>, transform_indices = @transform_6, window_bounds = array<i64: 1, 128>}, {transform_indices = @transform_7, window_bounds = array<i64: 16, 128>}]} {
    %c0 = arith.constant 0 : index
    %c0_0 = arith.constant 0 : index
    %0 = vector.load %arg2[%c0, %c0_0] : memref<784x256xbf16, #tpu.memory_space<vmem>>, vector<784x256xbf16>
    %c0_1 = arith.constant 0 : index
    %c0_2 = arith.constant 0 : index
    %1 = vector.load %arg3[%c0_1, %c0_2] : memref<1x256xf32, #tpu.memory_space<vmem>>, vector<1x256xf32>
    %c0_3 = arith.constant 0 : index
    %c0_4 = arith.constant 0 : index
    %2 = vector.load %arg4[%c0_3, %c0_4] : memref<256x128xbf16, #tpu.memory_space<vmem>>, vector<256x128xbf16>
    %c0_5 = arith.constant 0 : index
    %c0_6 = arith.constant 0 : index
    %3 = vector.load %arg5[%c0_5, %c0_6] : memref<1x128xf32, #tpu.memory_space<vmem>>, vector<1x128xf32>
    %c0_7 = arith.constant 0 : index
    %c0_8 = arith.constant 0 : index
    %4 = vector.load %arg6[%c0_7, %c0_8] : memref<128x128xbf16, #tpu.memory_space<vmem>>, vector<128x128xbf16>
    %c0_9 = arith.constant 0 : index
    %c0_10 = arith.constant 0 : index
    %5 = vector.load %arg7[%c0_9, %c0_10] : memref<1x128xf32, #tpu.memory_space<vmem>>, vector<1x128xf32>
    %c0_11 = arith.constant 0 : index
    %c0_12 = arith.constant 0 : index
    %6 = vector.load %arg1[%c0_11, %c0_12] : memref<16x784xbf16, #tpu.memory_space<vmem>>, vector<16x784xbf16>
    %cst = arith.constant dense<0.000000e+00> : vector<16x256xf32>
    %7 = tpu.matmul %6, %0, %cst {dimension_numbers = #tpu.dot_dimension_numbers<[1], [0], [0], [1], [0, 0, 1, 1], [], []>} : vector<16x784xbf16>, vector<784x256xbf16>, vector<16x256xf32> -> vector<16x256xf32>
    %8 = vector.broadcast %1 : vector<1x256xf32> to vector<16x256xf32>
    %9 = arith.addf %7, %8 : vector<16x256xf32>
    %cst_13 = arith.constant 0.000000e+00 : f32
    %10 = vector.broadcast %cst_13 : f32 to vector<16x256xf32>
    %11 = arith.maximumf %9, %10 : vector<16x256xf32>
    %12 = arith.truncf %11 : vector<16x256xf32> to vector<16x256xbf16>
    %cst_14 = arith.constant dense<0.000000e+00> : vector<16x128xf32>
    %13 = tpu.matmul %12, %2, %cst_14 {dimension_numbers = #tpu.dot_dimension_numbers<[1], [0], [0], [1], [0, 0, 1, 1], [], []>} : vector<16x256xbf16>, vector<256x128xbf16>, vector<16x128xf32> -> vector<16x128xf32>
    %14 = vector.broadcast %3 : vector<1x128xf32> to vector<16x128xf32>
    %15 = arith.addf %13, %14 : vector<16x128xf32>
    %cst_15 = arith.constant 0.000000e+00 : f32
    %16 = vector.broadcast %cst_15 : f32 to vector<16x128xf32>
    %17 = arith.maximumf %15, %16 : vector<16x128xf32>
    %18 = arith.truncf %17 : vector<16x128xf32> to vector<16x128xbf16>
    %cst_16 = arith.constant dense<0.000000e+00> : vector<16x128xf32>
    %19 = tpu.matmul %18, %4, %cst_16 {dimension_numbers = #tpu.dot_dimension_numbers<[1], [0], [0], [1], [0, 0, 1, 1], [], []>} : vector<16x128xbf16>, vector<128x128xbf16>, vector<16x128xf32> -> vector<16x128xf32>
    %20 = vector.broadcast %5 : vector<1x128xf32> to vector<16x128xf32>
    %21 = arith.addf %19, %20 : vector<16x128xf32>
    %c0_17 = arith.constant 0 : index
    %c0_18 = arith.constant 0 : index
    %22 = vector.load %arg8[%c0_17, %c0_18] : memref<16x128xf32, #tpu.memory_space<vmem>>, vector<16x128xf32>
    tpu.vector_store %arg8[%c0_17, %c0_18], %21 {strides = array<i32>} : memref<16x128xf32, #tpu.memory_space<vmem>>, vector<16x128xf32>,
    return
  }
  func.func @transform_0(%arg0: i32) -> (i32, i32) {
    %c0_i32 = arith.constant 0 : i32
    %c0_i32_0 = arith.constant 0 : i32
    return %arg0, %c0_i32 : i32, i32
  }
  func.func @transform_1(%arg0: i32) -> (i32, i32) {
    %c0_i32 = arith.constant 0 : i32
    %c0_i32_0 = arith.constant 0 : i32
    %c0_i32_1 = arith.constant 0 : i32
    return %c0_i32, %c0_i32_0 : i32, i32
  }
  func.func @transform_2(%arg0: i32) -> (i32, i32) {
    %c0_i32 = arith.constant 0 : i32
    %c0_i32_0 = arith.constant 0 : i32
    %c0_i32_1 = arith.constant 0 : i32
    return %c0_i32, %c0_i32_0 : i32, i32
  }
  func.func @transform_3(%arg0: i32) -> (i32, i32) {
    %c0_i32 = arith.constant 0 : i32
    %c0_i32_0 = arith.constant 0 : i32
    %c0_i32_1 = arith.constant 0 : i32
    return %c0_i32, %c0_i32_0 : i32, i32
  }
  func.func @transform_4(%arg0: i32) -> (i32, i32) {
    %c0_i32 = arith.constant 0 : i32
    %c0_i32_0 = arith.constant 0 : i32
    %c0_i32_1 = arith.constant 0 : i32
    return %c0_i32, %c0_i32_0 : i32, i32
  }
  func.func @transform_5(%arg0: i32) -> (i32, i32) {
    %c0_i32 = arith.constant 0 : i32
    %c0_i32_0 = arith.constant 0 : i32
    %c0_i32_1 = arith.constant 0 : i32
    return %c0_i32, %c0_i32_0 : i32, i32
  }
  func.func @transform_6(%arg0: i32) -> (i32, i32) {
    %c0_i32 = arith.constant 0 : i32
    %c0_i32_0 = arith.constant 0 : i32
    %c0_i32_1 = arith.constant 0 : i32
    return %c0_i32, %c0_i32_0 : i32, i32
  }
  func.func @transform_7(%arg0: i32) -> (i32, i32) {
    %c0_i32 = arith.constant 0 : i32
    %c0_i32_0 = arith.constant 0 : i32
    return %arg0, %c0_i32 : i32, i32
  }
}

</mosaic_0001>

<bundles_post_ra>
// kernel: tpu_custom_call.1
= control target key start
LH: loop header
LB: loop body
LE: loop exit
PB: predicated region body
PF: predicated region fallthrough
CT: control target
= control target key end

     0   :  { %12 = vsyncpa [#allocation3], 0  ;;  %s1799_s0 = inlined_call_operand.hbm [shape: bf16[16,784], index: 0, kind: input, shape index: {}]   ;;  %s1800_s1 = inlined_call_operand.hbm [shape: bf16[784,256], index: 1, kind: input, shape index: {}]   ;;  %s1801_s2 = inlined_call_operand.vmem [shape: f32[1,256], index: 2, kind: input, shape index: {}]   ;;  %s1802_s3 = inlined_call_operand.hbm [shape: bf16[256,128], index: 3, kind: input, shape index: {}]   ;;  %s1803_s4 = inlined_call_operand.vmem [shape: f32[1,128], index: 4, kind: input, shape index: {}]   ;;  %s1804_s5 = inlined_call_operand.hbm [shape: bf16[128,128], index: 5, kind: input, shape index: {}]   ;;  %s1805_s6 = inlined_call_operand.vmem [shape: f32[1,128], index: 6, kind: input, shape index: {}]   ;;  %s1806_s7 = inlined_call_operand.hbm [shape: f32[16,128], index: 7, kind: output, shape index: {}]  }
   0x1   :  { %13 = vsyncpa [#allocation6], 0 }
   0x2   :  { %14 = vsyncpa [#allocation9], 0 }
   0x3   :  { %15 = vsyncpa [#allocation4], 0  ;;  %s1706_s24 = smov [#allocation5]  }
   0x4   :  { %s33_s25 = sshll.u32 %s1706_s24, 4  ;;  %s34_s25 = int_to_ptr.vmem [resolvable:$true] %s33_s25 }
   0x5   :  { %s1606_s26 = scalar_lea.vmem %s34_s25, 12544  ;;  %p1611_p1 = scmp.lt.s32.totalorder %s34_s25, %s34_s25 }
   0x6   :  { %p1607_p0 = scmp.ne.s32.totalorder %s34_s25, %s1606_s26  ;;  %p1612_p2 = scmp.lt.s32.totalorder %s1606_s26, %s1606_s26 }
   0x8   :  { %p1613_p3 = por %p1612_p2, %p1611_p1 }
   0xa   :  { %p1614_p4 = pnand %p1613_p3, %p1607_p0 }
   0xc   :  { %1617 = shalt.err (!%p1614_p4)
}
   0xd   :  { %s1707_s27 = smov 128   ;;  %s1708_s28 = smov 8  }
   0xe   :  { %39 = dma.hbm_to_vmem [thread:$0]  %s1800_s1, 12544, %s34_s25, [#allocation6], %s1707_s27, %s1707_s27, %s1708_s28  }
   0xf   :  { %s1709_s8 = smov [#allocation2]  }
  0x10   :  { %s21_s9 = sshll.u32 %s1709_s8, 4  ;;  %s22_s9 = int_to_ptr.vmem [resolvable:$true] %s21_s9 }
  0x11   :  { %s1626_s10 = scalar_lea.vmem %s22_s9, 896  ;;  %p1631_p6 = scmp.lt.s32.totalorder %s22_s9, %s22_s9 }
  0x12   :  { %p1627_p5 = scmp.ne.s32.totalorder %s22_s9, %s1626_s10  ;;  %p1632_p7 = scmp.lt.s32.totalorder %s1626_s10, %s1626_s10 }
  0x14   :  { %p1633_p8 = por %p1632_p7, %p1631_p6 }
  0x16   :  { %p1634_p9 = pnand %p1633_p8, %p1627_p5 }
  0x18   :  { %1637 = shalt.err (!%p1634_p9)
}
  0x19   :  { %s1710_s11 = smov 448   ;;  %s1711_s12 = smov 28  }
  0x1a   :  { %27 = dma.hbm_to_vmem [thread:$0]  %s1799_s0, 896, %s22_s9, [#allocation3], %s1710_s11, %s1710_s11, %s1711_s12  }
  0x1b   :  { %s1712_s15 = smov [#allocation7]  }
  0x1c   :  { %s47_s16 = sshll.u32 %s1712_s15, 4  ;;  %s48_s16 = int_to_ptr.vmem [resolvable:$true] %s47_s16 }
  0x1d   :  { %s1646_s1 = scalar_lea.vmem %s48_s16, 2048  ;;  %p1651_p11 = scmp.lt.s32.totalorder %s48_s16, %s48_s16 }
  0x1e   :  { %p1647_p10 = scmp.ne.s32.totalorder %s48_s16, %s1646_s1  ;;  %p1652_p12 = scmp.lt.s32.totalorder %s1646_s1, %s1646_s1 }
  0x20   :  { %p1653_p13 = por %p1652_p12, %p1651_p11 }
  0x22   :  { %p1654_p0 = pnand %p1653_p13, %p1647_p10 }
  0x24   :  { %1657 = shalt.err (!%p1654_p0)
}
  0x25   :  { %s1713_s17 = smov 64   ;;  %s1714_s18 = smov 4  }
  0x26   :  { %53 = dma.hbm_to_vmem [thread:$0]  %s1802_s3, 2048, %s48_s16, [#allocation6], %s1713_s17, %s1713_s17, %s1714_s18  }
  0x27   :  { %s1715_s21 = smov [#allocation8]  }
  0x28   :  { %s61_s22 = sshll.u32 %s1715_s21, 4  ;;  %s62_s22 = int_to_ptr.vmem [resolvable:$true] %s61_s22 }
  0x29   :  { %s1666_s0 = scalar_lea.vmem %s62_s22, 1024  ;;  %p1671_p2 = scmp.lt.s32.totalorder %s62_s22, %s62_s22 }
  0x2a   :  { %p1667_p1 = scmp.ne.s32.totalorder %s62_s22, %s1666_s0  ;;  %p1672_p3 = scmp.lt.s32.totalorder %s1666_s0, %s1666_s0 }
  0x2c   :  { %p1673_p4 = por %p1672_p3, %p1671_p2 }
  0x2e   :  { %p1674_p5 = pnand %p1673_p4, %p1667_p1 }
  0x30   :  { %1677 = shalt.err (!%p1674_p5)
}
  0x31   :  { %67 = dma.hbm_to_vmem [thread:$0]  %s1804_s5, 1024, %s62_s22, [#allocation9], %s1713_s17, %s1713_s17, %s1714_s18  }
  0x32   :  { %1698 = dma.done.wait [#allocation3], 896  }
  0x33   :  { %1699 = vsyncadd [#allocation3], 4294966400 }
  0x34   :  { %1700 = dma.done.wait [#allocation6], 14592  }
  0x35   :  { %1701 = vsyncadd [#allocation6], 4294952704 }
  0x36   :  { %1702 = dma.done.wait [#allocation9], 1024  }
  0x37   :  { %1703 = vsyncadd [#allocation9], 4294966272  ;;  %v1417_v0 = vld [vmem:[#allocation5 + $0x74] ss:$8 sps:$4 sm:$0xff]   ;;  %v1419_v1 = vld [vmem:[#allocation5 + $0x70] ss:$8 sps:$4 sm:$0xff]  }
  0x38   :  { %780 = vmatprep.subr.bf16.mxu0 %v1417_v0  ;;  %v1420_v2 = vld [vmem:[#allocation5 + $0x174] ss:$8 sps:$4 sm:$0xff]   ;;  %v1422_v3 = vld [vmem:[#allocation5 + $0x170] ss:$8 sps:$4 sm:$0xff]   ;;  %v1423_v4 = vld [vmem:[#allocation5 + $0x64] ss:$8 sps:$4 sm:$0xff]  }
  0x39   :  { %781 = vmatpush1.bf16.msra.mxu0 %v1419_v1  ;;  %v1425_v5 = vld [vmem:[#allocation5 + $0x60] ss:$8 sps:$4 sm:$0xff]   ;;  %823 = vmatprep.subr.bf16.mxu1 %v1420_v2  ;;  %v1426_v6 = vld [vmem:[#allocation5 + $0x164] ss:$8 sps:$4 sm:$0xff]   ;;  %v1429_v8 = vld [vmem:[#allocation5 + $0x54] ss:$8 sps:$4 sm:$0xff]  }
  0x3a   :  { %824 = vmatpush1.bf16.msra.mxu1 %v1422_v3  ;;  %782 = vmatprep.subr.bf16.mxu0 %v1423_v4  ;;  %v1428_v7 = vld [vmem:[#allocation5 + $0x160] ss:$8 sps:$4 sm:$0xff]   ;;  %v1431_v9 = vld [vmem:[#allocation5 + $0x50] ss:$8 sps:$4 sm:$0xff]   ;;  %v1432_v10 = vld [vmem:[#allocation5 + $0x154] ss:$8 sps:$4 sm:$0xff]  }
  0x3b   :  { %825 = vmatprep.subr.bf16.mxu1 %v1426_v6  ;;  %v1435_v11 = vld [vmem:[#allocation5 + $0x44] ss:$8 sps:$4 sm:$0xff]   ;;  %v1434_v12 = vld [vmem:[#allocation5 + $0x150] ss:$8 sps:$4 sm:$0xff]   ;;  %v1437_v14 = vld [vmem:[#allocation5 + $0x40] ss:$8 sps:$4 sm:$0xff]  }
  0x3c   :  { %v1438_v13 = vld [vmem:[#allocation5 + $0x144] ss:$8 sps:$4 sm:$0xff]   ;;  %v1441_v15 = vld [vmem:[#allocation5 + $0x34] ss:$8 sps:$4 sm:$0xff]   ;;  %v1440_v16 = vld [vmem:[#allocation5 + $0x140] ss:$8 sps:$4 sm:$0xff]  }
  0x3d   :  { %783 = vmatpush1.bf16.msra.mxu0 %v1425_v5  ;;  %v1444_v17 = vld [vmem:[#allocation5 + $0x134] ss:$8 sps:$4 sm:$0xff]   ;;  %v1443_v18 = vld [vmem:[#allocation5 + $0x30] ss:$8 sps:$4 sm:$0xff]   ;;  %v1447_v19 = vld [vmem:[#allocation5 + $0x24] ss:$8 sps:$4 sm:$0xff]  }
  0x3e   :  { %784 = vmatprep.subr.bf16.mxu0 %v1429_v8  ;;  %826 = vmatpush1.bf16.msra.mxu1 %v1428_v7  ;;  %v1446_v20 = vld [vmem:[#allocation5 + $0x130] ss:$8 sps:$4 sm:$0xff]   ;;  %v1450_v21 = vld [vmem:[#allocation5 + $0x124] ss:$8 sps:$4 sm:$0xff]   ;;  %v1449_v22 = vld [vmem:[#allocation5 + $0x20] ss:$8 sps:$4 sm:$0xff]  }
  0x3f   :  { %827 = vmatprep.subr.bf16.mxu1 %v1432_v10  ;;  %v1453_v23 = vld [vmem:[#allocation5 + $0x14] ss:$8 sps:$4 sm:$0xff]   ;;  %v1452_v24 = vld [vmem:[#allocation5 + $0x120] ss:$8 sps:$4 sm:$0xff]   ;;  %v1455_v26 = vld [vmem:[#allocation5 + $0x10] ss:$8 sps:$4 sm:$0xff]  }
  0x40   :  { %v1456_v25 = vld [vmem:[#allocation5 + $0x114] ss:$8 sps:$4 sm:$0xff]   ;;  %v1459_v27 = vld [vmem:[#allocation5 + $0x4] ss:$8 sps:$4 sm:$0xff]   ;;  %v1458_v28 = vld [vmem:[#allocation5 + $0x110] ss:$8 sps:$4 sm:$0xff]  }
  0x41   :  { %785 = vmatpush1.bf16.msra.mxu0 %v1431_v9  ;;  %v1462_v29 = vld [vmem:[#allocation5 + $0x104] ss:$8 sps:$4 sm:$0xff]   ;;  %v1461_v30 = vld [vmem:[#allocation5] ss:$8 sps:$4 sm:$0xff]   ;;  %v1465_v31 = vld [vmem:[#allocation5 + $0xf4] ss:$8 sps:$4 sm:$0xff]  }
  0x42   :  { %786 = vmatprep.subr.bf16.mxu0 %v1435_v11  ;;  %828 = vmatpush1.bf16.msra.mxu1 %v1434_v12  ;;  %v1464_v32 = vld [vmem:[#allocation5 + $0x100] ss:$8 sps:$4 sm:$0xff]   ;;  %v1468_v33 = vld [vmem:[#allocation5 + $0x1f4] ss:$8 sps:$4 sm:$0xff]   ;;  %v1467_v34 = vld [vmem:[#allocation5 + $0xf0] ss:$8 sps:$4 sm:$0xff]  }
  0x43   :  { %829 = vmatprep.subr.bf16.mxu1 %v1438_v13  ;;  %v1471_v35 = vld [vmem:[#allocation5 + $0xe4] ss:$8 sps:$4 sm:$0xff]   ;;  %v1470_v36 = vld [vmem:[#allocation5 + $0x1f0] ss:$8 sps:$4 sm:$0xff]   ;;  %v1473_v38 = vld [vmem:[#allocation5 + $0xe0] ss:$8 sps:$4 sm:$0xff]  }
  0x44   :  { %v1474_v37 = vld [vmem:[#allocation5 + $0x1e4] ss:$8 sps:$4 sm:$0xff]   ;;  %v1477_v39 = vld [vmem:[#allocation5 + $0xd4] ss:$8 sps:$4 sm:$0xff]   ;;  %v1476_v40 = vld [vmem:[#allocation5 + $0x1e0] ss:$8 sps:$4 sm:$0xff]  }
  0x45   :  { %787 = vmatpush1.bf16.msra.mxu0 %v1437_v14  ;;  %v1480_v41 = vld [vmem:[#allocation5 + $0x1d4] ss:$8 sps:$4 sm:$0xff]   ;;  %v1479_v42 = vld [vmem:[#allocation5 + $0xd0] ss:$8 sps:$4 sm:$0xff]   ;;  %v1483_v43 = vld [vmem:[#allocation5 + $0xc4] ss:$8 sps:$4 sm:$0xff]  }
  0x46   :  { %788 = vmatprep.subr.bf16.mxu0 %v1441_v15  ;;  %830 = vmatpush1.bf16.msra.mxu1 %v1440_v16  ;;  %v1482_v44 = vld [vmem:[#allocation5 + $0x1d0] ss:$8 sps:$4 sm:$0xff]   ;;  %v1486_v45 = vld [vmem:[#allocation5 + $0x1c4] ss:$8 sps:$4 sm:$0xff]   ;;  %v1485_v46 = vld [vmem:[#allocation5 + $0xc0] ss:$8 sps:$4 sm:$0xff]  }
  0x47   :  { %831 = vmatprep.subr.bf16.mxu1 %v1444_v17  ;;  %v1514_v47 = vld [vmem:[#allocation2 + $0x4] ss:$28 sps:$4 sm:$0xff]   ;;  %v1489_v48 = vld [vmem:[#allocation5 + $0xb4] ss:$8 sps:$4 sm:$0xff]   ;;  %v1491_v52 = vld [vmem:[#allocation5 + $0xb0] ss:$8 sps:$4 sm:$0xff]  }
  0x48   :  { %v1488_v49 = vld [vmem:[#allocation5 + $0x1c0] ss:$8 sps:$4 sm:$0xff]   ;;  %812 = vmatprep.mubr.bf16.mxu0 %v1514_v47  ;;  %v1492_v50 = vld [vmem:[#allocation5 + $0x1b4] ss:$8 sps:$4 sm:$0xff]   ;;  %v1495_v53 = vld [vmem:[#allocation5 + $0xa4] ss:$8 sps:$4 sm:$0xff]  }
  0x49   :  { %789 = vmatpush1.bf16.msra.mxu0 %v1443_v18  ;;  %v1521_v51 = vld [vmem:[#allocation2 + $0xc] ss:$28 sps:$4 sm:$0xff]   ;;  %v1498_v55 = vld [vmem:[#allocation5 + $0x1a4] ss:$8 sps:$4 sm:$0xff]   ;;  %v1497_v56 = vld [vmem:[#allocation5 + $0xa0] ss:$8 sps:$4 sm:$0xff]  }
  0x4a   :  { %790 = vmatprep.subr.bf16.mxu0 %v1447_v19  ;;  %832 = vmatpush1.bf16.msra.mxu1 %v1446_v20  ;;  %v1494_v54 = vld [vmem:[#allocation5 + $0x1b0] ss:$8 sps:$4 sm:$0xff]   ;;  %v1501_v57 = vld [vmem:[#allocation5 + $0x94] ss:$8 sps:$4 sm:$0xff]   ;;  %v1500_v58 = vld [vmem:[#allocation5 + $0x1a0] ss:$8 sps:$4 sm:$0xff]  }
  0x4b   :  { %833 = vmatprep.subr.bf16.mxu1 %v1450_v21  ;;  %855 = vmatprep.mubr.bf16.mxu1 %v1521_v51  ;;  %v1504_v59 = vld [vmem:[#allocation5 + $0x194] ss:$8 sps:$4 sm:$0xff]   ;;  %v1503_v60 = vld [vmem:[#allocation5 + $0x90] ss:$8 sps:$4 sm:$0xff]   ;;  %v1507_v61 = vld [vmem:[#allocation5 + $0x84] ss:$8 sps:$4 sm:$0xff]  }
  0x4c   :  { %v1506_v62 = vld [vmem:[#allocation5 + $0x190] ss:$8 sps:$4 sm:$0xff]   ;;  %v1510_v63 = vld [vmem:[#allocation5 + $0x184] ss:$8 sps:$4 sm:$0xff]   ;;  %v1509_v0 = vld [vmem:[#allocation5 + $0x80] ss:$8 sps:$4 sm:$0xff]  }
  0x4d   :  { %791 = vmatpush1.bf16.msra.mxu0 %v1449_v22  ;;  %v1518_v1 = vld [vmem:[#allocation5 + $0x274] ss:$8 sps:$4 sm:$0xff]   ;;  %v1515_v2 = vld [vmem:[#allocation5 + $0x180] ss:$8 sps:$4 sm:$0xff]   ;;  %v1516_v4 = vld [vmem:[#allocation5 + $0x270] ss:$8 sps:$4 sm:$0xff]  }
  0x4e   :  { %792 = vmatprep.subr.bf16.mxu0 %v1453_v23  ;;  %834 = vmatpush1.bf16.msra.mxu1 %v1452_v24  ;;  %v1512_v3 = vld [vmem:[#allocation2] ss:$28 sps:$4 sm:$0xff]   ;;  %v1519_v5 = vld [vmem:[#allocation2 + $0x8] ss:$28 sps:$4 sm:$0xff]   ;;  %v1527_v10 = vld [vmem:[#allocation5 + $0x254] ss:$8 sps:$4 sm:$0xff]  }
  0x4f   :  { %835 = vmatprep.subr.bf16.mxu1 %v1456_v25  ;;  %v1524_v6 = vld [vmem:[#allocation5 + $0x264] ss:$8 sps:$4 sm:$0xff]   ;;  %v1564_v7 = vld [vmem:[#allocation5 + $0x300] ss:$8 sps:$4 sm:$0xff]   ;;  %v1525_v11 = vld [vmem:[#allocation5 + $0x250] ss:$8 sps:$4 sm:$0xff]  }
  0x50   :  { %v1566_v8 = vld [vmem:[#allocation5 + $0x304] ss:$8 sps:$4 sm:$0xff]   ;;  %v1522_v9 = vld [vmem:[#allocation5 + $0x260] ss:$8 sps:$4 sm:$0xff]   ;;  %v1716_v12 = vmov 0   ;;  %vm776_vm0 = vcmask 130048  }
  0x51   :  { %793 = vmatpush1.bf16.msra.mxu0 %v1455_v26  ;;  %v1530_v13 = vld [vmem:[#allocation5 + $0x244] ss:$8 sps:$4 sm:$0xff]   ;;  %v1570_v14 = vld [vmem:[#allocation2 + $0x18] ss:$28 sps:$4 sm:$0xff]   ;;  %v1531_v18 = vld [vmem:[#allocation5 + $0x230] ss:$8 sps:$4 sm:$0xff]  }
  0x52   :  { %794 = vmatprep.subr.bf16.mxu0 %v1459_v27  ;;  %836 = vmatpush1.bf16.msra.mxu1 %v1458_v28  ;;  %v1573_v15 = vld [vmem:[#allocation2 + $0x14] ss:$28 sps:$4 sm:$0xff]   ;;  %v1528_v16 = vld [vmem:[#allocation5 + $0x240] ss:$8 sps:$4 sm:$0xff]   ;;  %v1536_v19 = vld [vmem:[#allocation5 + $0x224] ss:$8 sps:$4 sm:$0xff]  }
  0x53   :  { %837 = vmatprep.subr.bf16.mxu1 %v1462_v29  ;;  %v1533_v17 = vld [vmem:[#allocation5 + $0x234] ss:$8 sps:$4 sm:$0xff]   ;;  %v1534_v20 = vld [vmem:[#allocation5 + $0x220] ss:$8 sps:$4 sm:$0xff]   ;;  %v1537_v22 = vld [vmem:[#allocation5 + $0x210] ss:$8 sps:$4 sm:$0xff]  }
  0x54   :  { %v1539_v21 = vld [vmem:[#allocation5 + $0x214] ss:$8 sps:$4 sm:$0xff]   ;;  %v1542_v23 = vld [vmem:[#allocation5 + $0x204] ss:$8 sps:$4 sm:$0xff]   ;;  %v1540_v24 = vld [vmem:[#allocation5 + $0x200] ss:$8 sps:$4 sm:$0xff]  }
  0x55   :  { %795 = vmatpush1.bf16.msra.mxu0 %v1461_v30  ;;  %v1545_v25 = vld [vmem:[#allocation5 + $0x2f4] ss:$8 sps:$4 sm:$0xff]   ;;  %v1543_v26 = vld [vmem:[#allocation5 + $0x2f0] ss:$8 sps:$4 sm:$0xff]   ;;  %v1548_v27 = vld [vmem:[#allocation5 + $0x2e4] ss:$8 sps:$4 sm:$0xff]  }
  0x56   :  { %796 = vmatprep.subr.bf16.mxu0 %v1465_v31  ;;  %838 = vmatpush1.bf16.msra.mxu1 %v1464_v32  ;;  %v1546_v28 = vld [vmem:[#allocation5 + $0x2e0] ss:$8 sps:$4 sm:$0xff]   ;;  %v1551_v29 = vld [vmem:[#allocation5 + $0x2d4] ss:$8 sps:$4 sm:$0xff]   ;;  %v1549_v30 = vld [vmem:[#allocation5 + $0x2d0] ss:$8 sps:$4 sm:$0xff]  }
  0x57   :  { %839 = vmatprep.subr.bf16.mxu1 %v1468_v33  ;;  %v1554_v31 = vld [vmem:[#allocation5 + $0x2c4] ss:$8 sps:$4 sm:$0xff]   ;;  %v1552_v32 = vld [vmem:[#allocation5 + $0x2c0] ss:$8 sps:$4 sm:$0xff]   ;;  %v1557_v33 = vld [vmem:[#allocation5 + $0x2b4] ss:$8 sps:$4 sm:$0xff]  }
  0x58   :  { %v1579_v47 = vld [vmem:[#allocation7 + $0x28] sm:$0xff]   ;;  %v1583_v51 = vld [vmem:[#allocation7 + $0x18] sm:$0xff]   ;;  %vm1718_vm1 = vmmov 0   ;;  %s1719_s30 = smov [#allocation10]  }
  0x59   :  { %797 = vmatpush2.bf16.msra.mxu0 %v1467_v34  ;;  %v1555_v34 = vld [vmem:[#allocation5 + $0x2b0] ss:$8 sps:$4 sm:$0xff]   ;;  %s1206_s8 = sshll.u32 %s1719_s30, 4  ;;  %s1207_s8 = int_to_ptr.vmem [resolvable:$true] %s1206_s8 }
  0x5a   :  { %798 = vmatprep.subr.bf16.mxu0 %v1471_v35  ;;  %840 = vmatpush2.bf16.msra.mxu1 %v1470_v36  ;;  %v1560_v35 = vld [vmem:[#allocation5 + $0x2a4] ss:$8 sps:$4 sm:$0xff]   ;;  %v1558_v36 = vld [vmem:[#allocation5 + $0x2a0] ss:$8 sps:$4 sm:$0xff]   ;;  %p1683_p7 = scmp.lt.s32.totalorder %s1207_s8, %s1207_s8 }
  0x5b   :  { %841 = vmatprep.subr.bf16.mxu1 %v1474_v37  ;;  %v1563_v37 = vld [vmem:[#allocation5 + $0x294] ss:$8 sps:$4 sm:$0xff]  }
  0x5d   :  { %799 = vmatpush2.bf16.msra.mxu0 %v1473_v38  ;;  %v1561_v38 = vld [vmem:[#allocation5 + $0x290] ss:$8 sps:$4 sm:$0xff]  }
  0x5e   :  { %800 = vmatprep.subr.bf16.mxu0 %v1477_v39  ;;  %842 = vmatpush2.bf16.msra.mxu1 %v1476_v40  ;;  %v1569_v39 = vld [vmem:[#allocation5 + $0x284] ss:$8 sps:$4 sm:$0xff]   ;;  %v1567_v40 = vld [vmem:[#allocation5 + $0x280] ss:$8 sps:$4 sm:$0xff]  }
  0x5f   :  { %843 = vmatprep.subr.bf16.mxu1 %v1480_v41  ;;  %v1571_v41 = vld [vmem:[#allocation2 + $0x10] ss:$28 sps:$4 sm:$0xff]  }
  0x61   :  { %801 = vmatpush2.bf16.msra.mxu0 %v1479_v42  ;;  %v1574_v42 = vld [vmem:[#allocation7 + $0x78] sm:$0xff]  }
  0x62   :  { %802 = vmatprep.subr.bf16.mxu0 %v1483_v43  ;;  %844 = vmatpush2.bf16.msra.mxu1 %v1482_v44  ;;  %v1575_v43 = vld [vmem:[#allocation7 + $0x38] sm:$0xff]   ;;  %v1576_v44 = vld [vmem:[#allocation7 + $0x70] sm:$0xff]  }
  0x63   :  { %845 = vmatprep.subr.bf16.mxu1 %v1486_v45  ;;  %v1577_v45 = vld [vmem:[#allocation7 + $0x30] sm:$0xff]  }
  0x65   :  { %803 = vmatpush2.bf16.msra.mxu0 %v1485_v46  ;;  %v1578_v46 = vld [vmem:[#allocation7 + $0x68] sm:$0xff]  }
  0x66   :  { %804 = vmatprep.subr.bf16.mxu0 %v1489_v48  ;;  %846 = vmatpush2.bf16.msra.mxu1 %v1488_v49  ;;  %v1580_v48 = vld [vmem:[#allocation7 + $0x60] sm:$0xff]  }
  0x67   :  { %847 = vmatprep.subr.bf16.mxu1 %v1492_v50  ;;  %v1581_v49 = vld [vmem:[#allocation7 + $0x20] sm:$0xff]   ;;  %v1582_v50 = vld [vmem:[#allocation7 + $0x58] sm:$0xff]  }
  0x69   :  { %805 = vmatpush2.bf16.msra.mxu0 %v1491_v52  ;;  %v1584_v52 = vld [vmem:[#allocation7 + $0x50] sm:$0xff]  }
  0x6a   :  { %806 = vmatprep.subr.bf16.mxu0 %v1495_v53  ;;  %848 = vmatpush2.bf16.msra.mxu1 %v1494_v54  ;;  %v1585_v53 = vld [vmem:[#allocation7 + $0x10] sm:$0xff]   ;;  %v1586_v54 = vld [vmem:[#allocation7 + $0x48] sm:$0xff]  }
  0x6b   :  { %849 = vmatprep.subr.bf16.mxu1 %v1498_v55  ;;  %v1587_v55 = vld [vmem:[#allocation7 + $0x8] sm:$0xff]  }
  0x6d   :  { %807 = vmatpush2.bf16.msra.mxu0 %v1497_v56  ;;  %v1588_v56 = vld [vmem:[#allocation7 + $0x40] sm:$0xff]  }
  0x6e   :  { %808 = vmatprep.subr.bf16.mxu0 %v1501_v57  ;;  %850 = vmatpush2.bf16.msra.mxu1 %v1500_v58  ;;  %v1589_v57 = vld [vmem:[#allocation7] sm:$0xff]   ;;  %v1717_v58 = vmov 0.0  }
  0x6f   :  { %851 = vmatprep.subr.bf16.mxu1 %v1504_v59  ;;  %v241_v59 = vlaneseq }
  0x71   :  { %809 = vmatpush2.bf16.msra.mxu0 %v1503_v60 }
  0x72   :  { %810 = vmatprep.subr.bf16.mxu0 %v1507_v61  ;;  %852 = vmatpush2.bf16.msra.mxu1 %v1506_v62  ;;  %v242_v61 = vshrl.u32 %v241_v59, 7 }
  0x73   :  { %853 = vmatprep.subr.bf16.mxu1 %v1510_v63 }
  0x75   :  { %811 = vmatpush2.bf16.msra.mxu0 %v1509_v0  ;;  %v247_v0 = vsub.s32 1, %v242_v61 }
  0x76   :  { %866 = vmatprep.subr.bf16.mxu0 %v1518_v1  ;;  %854 = vmatpush2.bf16.msra.mxu1 %v1515_v2  ;;  %v181_v1 = vld [vmem:[%s1801_s2] sm:$0x3]  ;;  %v243_v2 = vsub.s32 0, %v242_v61 }
  0x77   :  { %923 = vmatprep.subr.bf16.mxu1 %v1566_v8 }
  0x78   :  { %813 = vmatmul.mubr.bf16.vlgmr.msra.gmra.mxu0 %v1512_v3 }
  0x79   :  { %867 = vmatpush1.bf16.msra.mxu0 %v1516_v4  ;;  %856 = vmatmul.mubr.bf16.vlgmr.msra.gmra.mxu1 %v1519_v5  ;;  %v248_v5 = vrot.slane %v181_v1, %v247_v0 }
  0x7a   :  { %868 = vmatprep.subr.bf16.mxu0 %v1524_v6  ;;  %941 = vmatprep.mubr.bf16.mxu1 %v1716_v12  ;;  %v244_v6 = vrot.slane %v181_v1, %v243_v2 }
  0x7b   :  { %924 = vmatpush1.bf16.msra.mxu1 %v1564_v7  ;;  %898 = vmatprep.mubr.bf16.mxu0 %v1573_v15 }
  0x7c   :  { %1352 = vmatprep.subr.bf16.mxu1 %v1574_v42  ;;  %v1592_v42 = vld [vmem:[#allocation8 + $0x28] sm:$0xff]  }
  0x7d   :  { %869 = vmatpush1.bf16.msra.mxu0 %v1522_v9 }
  0x7e   :  { %870 = vmatprep.subr.bf16.mxu0 %v1527_v10 }
  0x81   :  { %871 = vmatpush1.bf16.msra.mxu0 %v1525_v11  ;;  %1325 = vmatmul.mubr.msk.bf16.vlgmr.msra.gmra.mxu1 %vm776_vm0, %v1570_v14 }
  0x82   :  { %872 = vmatprep.subr.bf16.mxu0 %v1530_v13  ;;  %1353 = vmatpush3.bf16.msra.mxu1 %v1575_v43  ;;  %v1593_v43 = vld [vmem:[#allocation8 + $0x20] sm:$0xff]  }
  0x83   :  { %1354 = vmatprep.subr.bf16.mxu1 %v1576_v44  ;;  %v1594_v44 = vld [vmem:[#allocation8 + $0x18] sm:$0xff]  }
  0x85   :  { %873 = vmatpush1.bf16.msra.mxu0 %v1528_v16 }
  0x86   :  { %874 = vmatprep.subr.bf16.mxu0 %v1533_v17  ;;  %1355 = vmatpush3.bf16.msra.mxu1 %v1577_v45  ;;  %v1595_v45 = vld [vmem:[#allocation8 + $0x10] sm:$0xff]  }
  0x87   :  { %1356 = vmatprep.subr.bf16.mxu1 %v1578_v46  ;;  %v1596_v46 = vld [vmem:[#allocation8 + $0x8] sm:$0xff]  }
  0x89   :  { %875 = vmatpush1.bf16.msra.mxu0 %v1531_v18 }
  0x8a   :  { %876 = vmatprep.subr.bf16.mxu0 %v1536_v19  ;;  %1357 = vmatpush3.bf16.msra.mxu1 %v1579_v47  ;;  %v1597_v47 = vld [vmem:[#allocation8] sm:$0xff]  }
  0x8b   :  { %1358 = vmatprep.subr.bf16.mxu1 %v1580_v48 }
  0x8d   :  { %877 = vmatpush1.bf16.msra.mxu0 %v1534_v20 }
  0x8e   :  { %878 = vmatprep.subr.bf16.mxu0 %v1539_v21  ;;  %1359 = vmatpush3.bf16.msra.mxu1 %v1581_v49 }
  0x8f   :  { %1360 = vmatprep.subr.bf16.mxu1 %v1582_v50 }
  0x91   :  { %879 = vmatpush1.bf16.msra.mxu0 %v1537_v22 }
  0x92   :  { %880 = vmatprep.subr.bf16.mxu0 %v1542_v23  ;;  %1361 = vmatpush3.bf16.msra.mxu1 %v1583_v51  ;;  %v1326_v51 = vld [vmem:[%s1803_s4] ss:$0 sm:$0xff]  ;;  %s1678_s4 = scalar_lea.vmem %s1207_s8, 256 }
  0x93   :  { %1362 = vmatprep.subr.bf16.mxu1 %v1584_v52  ;;  %p1679_p6 = scmp.ne.s32.totalorder %s1207_s8, %s1678_s4  ;;  %p1684_p8 = scmp.lt.s32.totalorder %s1678_s4, %s1678_s4 }
  0x95   :  { %881 = vmatpush1.bf16.msra.mxu0 %v1540_v24  ;;  %p1685_p9 = por %p1684_p8, %p1683_p7 }
  0x96   :  { %882 = vmatprep.subr.bf16.mxu0 %v1545_v25  ;;  %1363 = vmatpush3.bf16.msra.mxu1 %v1585_v53 }
  0x97   :  { %1364 = vmatprep.subr.bf16.mxu1 %v1586_v54  ;;  %p1686_p10 = pnand %p1685_p9, %p1679_p6 }
  0x99   :  { %883 = vmatpush2.bf16.msra.mxu0 %v1543_v26 }
  0x9a   :  { %884 = vmatprep.subr.bf16.mxu0 %v1548_v27  ;;  %1365 = vmatpush3.bf16.msra.mxu1 %v1587_v55 }
  0x9b   :  { %1366 = vmatprep.subr.bf16.mxu1 %v1588_v56 }
  0x9d   :  { %885 = vmatpush2.bf16.msra.mxu0 %v1546_v28 }
  0x9e   :  { %886 = vmatprep.subr.bf16.mxu0 %v1551_v29  ;;  %1367 = vmatpush3.bf16.msra.mxu1 %v1589_v57 }
  0x9f   :  { %1383 = vmatprep.subr.bf16.mxu1 %v1717_v58 }
  0xa1   :  { %887 = vmatpush2.bf16.msra.mxu0 %v1549_v30 }
  0xa2   :  { %888 = vmatprep.subr.bf16.mxu0 %v1554_v31 }
  0xa5   :  { %889 = vmatpush2.bf16.msra.mxu0 %v1552_v32 }
  0xa6   :  { %890 = vmatprep.subr.bf16.mxu0 %v1557_v33 }
  0xa9   :  { %891 = vmatpush2.bf16.msra.mxu0 %v1555_v34 }
  0xaa   :  { %892 = vmatprep.subr.bf16.mxu0 %v1560_v35 }
  0xad   :  { %893 = vmatpush2.bf16.msra.mxu0 %v1558_v36 }
  0xae   :  { %894 = vmatprep.subr.bf16.mxu0 %v1563_v37 }
  0xb1   :  { %895 = vmatpush2.bf16.msra.mxu0 %v1561_v38 }
  0xb2   :  { %896 = vmatprep.subr.bf16.mxu0 %v1569_v39  ;;  %v1590_v39 = vld [vmem:[#allocation8 + $0x38] sm:$0xff]  }
  0xb5   :  { %897 = vmatpush2.bf16.msra.mxu0 %v1567_v40 }
  0xb8   :  { %899 = vmatmul.mubr.bf16.vlgmr.msra.gmra.mxu0 %v1571_v41  ;;  %v1591_v41 = vld [vmem:[#allocation8 + $0x30] sm:$0xff]  }
 0x138   :  { %v814_v62 = vpop.f32.mrf.mxu0 }
 0x139   :  { %v857_v60 = vpop.f32.mrf.mxu1  ;;  %v815_v11 = vadd.f32 %v814_v62, %v244_v6 }
 0x13a   :  { %v816_v3 = vpop.f32.mrf.mxu0 }
 0x13b   :  { %v859_v63 = vpop.f32.mrf.mxu1  ;;  %v817_v10 = vadd.f32 %v816_v3, %v248_v5  ;;  %v858_v18 = vadd.f32 %v857_v60, %v815_v11 }
 0x13c   :  { %v818_v7 = vpop.f32.mrf.mxu0 }
 0x13d   :  { %v861_v4 = vpop.f32.mrf.mxu1  ;;  %v819_v13 = vadd.f32 %v818_v7, %v244_v6  ;;  %v860_v16 = vadd.f32 %v859_v63, %v817_v10 }
 0x13e   :  { %v820_v12 = vpop.f32.mrf.mxu0 }
 0x13f   :  { %v863_v8 = vpop.f32.mrf.mxu1  ;;  %v821_v17 = vadd.f32 %v820_v12, %v248_v5  ;;  %v862_v20 = vadd.f32 %v861_v4, %v819_v13 }
 0x141   :  { %v943_v9 = vpop.f32.mrf.mxu1  ;;  %v864_v25 = vadd.f32 %v863_v8, %v821_v17 }
 0x143   :  { %v945_v14 = vpop.f32.mrf.mxu1 }
 0x145   :  { %v947_v23 = vpop.f32.mrf.mxu1 }
 0x147   :  { %v949_v32 = vpop.f32.mrf.mxu1 }
 0x178   :  { %v900_v15 = vpop.f32.mrf.mxu0 }
 0x179   :  { %v901_v22 = vadd.f32 %v900_v15, %v858_v18 }
 0x17a   :  { %v902_v19 = vpop.f32.mrf.mxu0 }
 0x17b   :  { %v903_v21 = vadd.f32 %v902_v19, %v860_v16  ;;  %v944_v31 = vadd.f32 %v943_v9, %v901_v22 }
 0x17c   :  { %v904_v24 = vpop.f32.mrf.mxu0 }
 0x17d   :  { %v905_v26 = vadd.f32 %v904_v24, %v862_v20  ;;  %v946_v28 = vadd.f32 %v945_v14, %v903_v21  ;;  %v952_v37 = vmax.f32 %v944_v31, 0.0 }
 0x17e   :  { %v906_v27 = vpop.f32.mrf.mxu0 }
 0x17f   :  { %v948_v29 = vadd.f32 %v947_v23, %v905_v26  ;;  %v907_v30 = vadd.f32 %v906_v27, %v864_v25  ;;  %v953_v35 = vmax.f32 %v946_v28, 0.0 }
 0x181   :  { %v950_v33 = vadd.f32 %v949_v32, %v907_v30  ;;  %v954_v34 = vmax.f32 %v948_v29, 0.0 }
 0x183   :  { %v955_v36 = vmax.f32 %v950_v33, 0.0  ;;  %v956_v40 = vpack.c.bf16 %v954_v34, %v952_v37 }
 0x185   :  { %v957_v38 = vpack.c.bf16 %v955_v36, %v953_v35 }
 0x187   :  { %1092 = vmatprep.mubr.bf16.mxu1 %v957_v38 }
 0x188   :  { %1093 = vmatmul.mubr.bf16.vlgmr.msra.gmra.mxu1 %v956_v40 }
 0x189   :  { %1384 = vmatpush3.bf16.msra.mxu1 %v1590_v39  ;;  %1399 = vmatprep.mubr.msk.bf16.mxu1 %vm1718_vm1, %v1717_v58 }
 0x18a   :  { %1385 = vmatprep.subr.bf16.mxu1 %v1717_v58 }
 0x18d   :  { %1386 = vmatpush3.bf16.msra.mxu1 %v1591_v41 }
 0x18e   :  { %1387 = vmatprep.subr.bf16.mxu1 %v1717_v58 }
 0x191   :  { %1388 = vmatpush3.bf16.msra.mxu1 %v1592_v42 }
 0x192   :  { %1389 = vmatprep.subr.bf16.mxu1 %v1717_v58 }
 0x195   :  { %1390 = vmatpush3.bf16.msra.mxu1 %v1593_v43 }
 0x196   :  { %1391 = vmatprep.subr.bf16.mxu1 %v1717_v58 }
 0x199   :  { %1392 = vmatpush3.bf16.msra.mxu1 %v1594_v44 }
 0x19a   :  { %1393 = vmatprep.subr.bf16.mxu1 %v1717_v58 }
 0x19d   :  { %1394 = vmatpush3.bf16.msra.mxu1 %v1595_v45 }
 0x19e   :  { %1395 = vmatprep.subr.bf16.mxu1 %v1717_v58 }
 0x1a1   :  { %1396 = vmatpush3.bf16.msra.mxu1 %v1596_v46 }
 0x1a2   :  { %1397 = vmatprep.subr.bf16.mxu1 %v1717_v58  ;;  %v1343_v58 = vld [vmem:[%s1805_s6] ss:$0 sm:$0xff] }
 0x1a5   :  { %1398 = vmatpush3.bf16.msra.mxu1 %v1597_v47 }
 0x248   :  { %v1368_v48 = vpop.f32.mrf.mxu1 }
 0x24a   :  { %v1369_v49 = vpop.f32.mrf.mxu1 }
 0x24b   :  { %v1370_v50 = vadd.f32 %v1369_v49, %v1368_v48 }
 0x24c   :  { %v1371_v52 = vpop.f32.mrf.mxu1 }
 0x24d   :  { %v1095_v54 = vadd.f32 %v1370_v50, %v1326_v51 }
 0x24e   :  { %v1372_v53 = vpop.f32.mrf.mxu1 }
 0x24f   :  { %v1373_v55 = vadd.f32 %v1372_v53, %v1371_v52  ;;  %v1101_v57 = vmax.f32 %v1095_v54, 0.0 }
 0x251   :  { %v1098_v56 = vadd.f32 %v1373_v55, %v1326_v51 }
 0x253   :  { %v1102_v59 = vmax.f32 %v1098_v56, 0.0 }
 0x255   :  { %v1103_v60 = vpack.c.bf16 %v1102_v59, %v1101_v57 }
 0x257   :  { %1400 = vmatmul.mubr.bf16.vlgmr.msra.gmra.mxu1 %v1103_v60 }
 0x317   :  { %v1192_v61 = vpop.f32.mrf.mxu1 }
 0x318   :  { %v1193_v62 = vadd.f32 %v1343_v58, %v1192_v61 }
 0x319   :  { %v1401_v63 = vpop.f32.mrf.mxu1 }
 0x31a   :  { %1199 = vst [vmem:[#allocation10] sm:$0xff] %v1193_v62 }
 0x31b   :  { %v1195_v0 = vpop.f32.mrf.mxu1 }
 0x31c   :  { %v1196_v1 = vadd.f32 %v1343_v58, %v1195_v0 }
 0x31d   :  { %v1402_v2 = vpop.f32.mrf.mxu1 }
 0x31e   :  { %1200 = vst [vmem:[#allocation10 + $0x8] sm:$0xff] %v1196_v1 }
 0x31f   :  { %1689 = shalt.err (!%p1686_p10)
}
 0x320   :  { %1212 = dma.vmem_to_hbm [thread:$0]  %s1207_s8, 256, %s1806_s7, [#allocation4], %s1707_s27, %s1707_s27, %s1708_s28  }
 0x321   :  { %1704 = dma.done.wait [#allocation4], 256  }
 0x322   :  { %1705 = vsyncadd [#allocation4], 4294967040 }
 0x323   :  { %1216 = vsyncpa [#allocation3], 1 }
 0x324   :  { %1217 = vsyncpa [#allocation6], 1 }
 0x325   :  { %1218 = vsyncpa [#allocation9], 1 }
 0x326   :  { %1219 = vsyncpa [#allocation4], 1 }

</bundles_post_ra>
